<compile_context>
chip_gen: v6e
topology: v6e:2x2x1
jax: 0.10.0
libtpu: 0.0.40
codegen_flags: <defaults>
</compile_context>

<pallas_src>
import math

import jax
import jax.numpy as jnp
from jax.experimental import pallas as pl
from jax.experimental.pallas import tpu as pltpu

_VMEM_LIMIT_BYTES = 32 * 1024 * 1024   # scoped-VMEM limit; safe headroom on v7x (64 MiB physical)
_TILE_TARGET_BYTES = 4 * 1024 * 1024   # per x/out tile target (~85%+ of HBM roofline)
_TILE_MIN_BYTES = 1 * 1024 * 1024      # don't shrink tiles below ~this when forcing extra steps
_MIN_GRID_STEPS = 4                    # >= 2 pipelined steps per TensorCore on v7x


def _offset_scale_kernel(x_ref, g_ref, b_ref, o_ref):
    # x_ref/o_ref: (TM, TD) tile; g_ref/b_ref: (1, TD), already in x.dtype.
    o_ref[...] = x_ref[...] * g_ref[...] + b_ref[...]


def _round_up(n, m):
    return ((n + m - 1) // m) * m


def _fold_factor(R, D):
    """Fold factor k>=1 such that (k*D) % 128 == 0 and R % k == 0 (lane densification)."""
    if D % 128 == 0:
        return 1
    k = 128 // math.gcd(D, 128)
    if k > 1 and R % k == 0:
        return k
    return 1


def _choose_tiles(R, D, itemsize):
    """Pick (row_tile, d_tile) for the flattened (R, D) problem."""
    rows_needed = _round_up(max(R, 1), 8)

    # Lane (D) tiling: only when even an 8-row full-D tile exceeds the per-tile target.
    if 8 * D * itemsize > _TILE_TARGET_BYTES and D > 128:
        d_tile = max(128, (_TILE_TARGET_BYTES // (8 * itemsize) // 128) * 128)
        d_tile = min(d_tile, (D // 128) * 128 if D % 128 == 0 else d_tile)
        return 8, int(d_tile)

    d_tile = D
    row_bytes = max(1, D * itemsize)

    # Byte-based row tile: target ~_TILE_TARGET_BYTES per x/out tile, sublane aligned.
    row_tile = max(8, (_TILE_TARGET_BYTES // row_bytes // 8) * 8)
    row_tile = min(row_tile, rows_needed)

    # Keep enough grid steps for pipelining / megacore sharding, but only when there is
    # enough work that each step still moves >= ~_TILE_MIN_BYTES.
    total_bytes = rows_needed * row_bytes
    if total_bytes >= _MIN_GRID_STEPS * _TILE_MIN_BYTES:
        target_steps = _MIN_GRID_STEPS
    elif total_bytes >= 2 * _TILE_MIN_BYTES:
        target_steps = 2
    else:
        target_steps = 1
    if target_steps > 1:
        per_step_rows = _round_up(pl.cdiv(rows_needed, target_steps), 8)
        row_tile = min(row_tile, max(8, per_step_rows))

    return int(row_tile), int(d_tile)


def offset_scale(x, gamma, beta, *, row_tile=None, d_tile=None, donate_x=False):
    """out = x * gamma + beta, broadcast over the last dim, via Pallas.

    x: (..., D);  gamma, beta: (D,).
    donate_x=True aliases x with the output (caller must be able to donate x).
    """
    orig_shape = x.shape
    D = orig_shape[-1]
    x2d = x.reshape(-1, D)
    R = x2d.shape[0]
    itemsize = jnp.dtype(x2d.dtype).itemsize

    # Lane densification: fold rows into lanes when D is not a multiple of 128.
    k = _fold_factor(R, D)
    if k > 1:
        x2d = x2d.reshape(R // k, k * D)
        g_row = jnp.tile(gamma, k)
        b_row = jnp.tile(beta, k)
    else:
        g_row, b_row = gamma, beta
    Rk, Dk = x2d.shape

    # Pre-cast params to x.dtype once in the wrapper (O(D) work, not O(R*D)).
    g2d = g_row.astype(x2d.dtype).reshape(1, Dk)
    b2d = b_row.astype(x2d.dtype).reshape(1, Dk)

    auto_rt, auto_dt = _choose_tiles(Rk, Dk, itemsize)
    if row_tile is None:
        row_tile = auto_rt
    if d_tile is None:
        d_tile = auto_dt

    grid = (pl.cdiv(Rk, row_tile), pl.cdiv(Dk, d_tile))

    extra = {}
    if donate_x:
        extra["input_output_aliases"] = {0: 0}

    out2d = pl.pallas_call(
        _offset_scale_kernel,
        out_shape=jax.ShapeDtypeStruct((Rk, Dk), x2d.dtype),
        grid_spec=pltpu.PrefetchScalarGridSpec(
            num_scalar_prefetch=0,
            grid=grid,
            in_specs=[
                pl.BlockSpec((row_tile, d_tile), lambda i, j: (i, j)),
                pl.BlockSpec((1, d_tile), lambda i, j: (0, j)),
                pl.BlockSpec((1, d_tile), lambda i, j: (0, j)),
            ],
            out_specs=pl.BlockSpec((row_tile, d_tile), lambda i, j: (i, j)),
        ),
        compiler_params=pltpu.CompilerParams(
            dimension_semantics=("parallel", "parallel"),
            vmem_limit_bytes=_VMEM_LIMIT_BYTES,
        ),
        **extra,
    )(x2d, g2d, b2d)

    return out2d.reshape(orig_shape)


def _reference(x, gamma, beta):
    return (x * gamma.astype(x.dtype) + beta.astype(x.dtype)).astype(x.dtype)


if __name__ == "__main__":
    key = jax.random.PRNGKey(0)
    k_x, k_g, k_b, k_x2, k_x3, k_x4 = jax.random.split(key, 6)

    # 1) Canonical small shape (batch=2, seq=8, dim=128), module-default init.
    B, S, D = 2, 8, 128
    x = jax.random.normal(k_x, (B, S, D), dtype=jnp.float32)
    gamma0 = jnp.ones((D,), dtype=jnp.float32)
    beta0 = jnp.zeros((D,), dtype=jnp.float32)
    out0 = jax.block_until_ready(offset_scale(x, gamma0, beta0))
    assert out0.shape == x.shape
    assert jnp.allclose(out0, _reference(x, gamma0, beta0), atol=1e-6, rtol=1e-6)

    # 2) Non-trivial deterministic params (exercise the broadcast paths).
    gamma = 1.0 + 0.1 * jax.random.normal(k_g, (D,), dtype=jnp.float32)
    beta = 0.1 * jax.random.normal(k_b, (D,), dtype=jnp.float32)
    out1 = jax.block_until_ready(offset_scale(x, gamma, beta))
    assert jnp.allclose(out1, _reference(x, gamma, beta), atol=1e-6, rtol=1e-6)

    # 3) Ragged row count (R = 15) -> masked tail row block.
    x_rag = jax.random.normal(k_x2, (3, 5, D), dtype=jnp.float32)
    out2 = jax.block_until_ready(offset_scale(x_rag, gamma, beta))
    assert out2.shape == x_rag.shape
    assert jnp.allclose(out2, _reference(x_rag, gamma, beta), atol=1e-6, rtol=1e-6)

    # 4) D not a multiple of 128 with R % k == 0 -> lane-folding path (k = 4).
    D2 = 32
    gamma2 = 1.0 + 0.1 * jax.random.normal(k_g, (D2,), dtype=jnp.float32)
    beta2 = 0.1 * jax.random.normal(k_b, (D2,), dtype=jnp.float32)
    x_sm = jax.random.normal(k_x3, (2, 8, D2), dtype=jnp.float32)
    out3 = jax.block_until_ready(offset_scale(x_sm, gamma2, beta2))
    assert out3.shape == x_sm.shape
    assert jnp.allclose(out3, _reference(x_sm, gamma2, beta2), atol=1e-6, rtol=1e-6)

    # 5) D not a multiple of 128, rows don't fold -> narrow-D fallback (full-D block).
    x_sm2 = jax.random.normal(k_x4, (3, 5, D2), dtype=jnp.float32)
    out4 = jax.block_until_ready(offset_scale(x_sm2, gamma2, beta2))
    assert out4.shape == x_sm2.shape
    assert jnp.allclose(out4, _reference(x_sm2, gamma2, beta2), atol=1e-6, rtol=1e-6)

    # 6) bf16 activations: params pre-cast to bf16; compute/output stay bf16.
    xb = x.astype(jnp.bfloat16)
    out5 = jax.block_until_ready(offset_scale(xb, gamma, beta))
    ref5 = _reference(xb, gamma, beta)
    assert out5.dtype == jnp.bfloat16
    assert jnp.allclose(out5.astype(jnp.float32), ref5.astype(jnp.float32),
                        atol=2e-2, rtol=2e-2)

    print("KERNEL_OK")
</pallas_src>

<mosaic_0001>
module attributes {stable_mosaic.version = 11 : i64} {
  func.func @_offset_scale_kernel(%arg0: i32, %arg1: i32, %arg2: memref<16x128xf32, #tpu.memory_space<vmem>>, %arg3: memref<1x128xf32, #tpu.memory_space<vmem>>, %arg4: memref<1x128xf32, #tpu.memory_space<vmem>>, %arg5: memref<16x128xf32, #tpu.memory_space<vmem>>) attributes {dimension_semantics = [#tpu.dimension_semantics<parallel>, #tpu.dimension_semantics<parallel>], iteration_bounds = array<i64: 1, 1>, scalar_prefetch = 0 : i64, scratch_operands = 0 : i64, tpu.core_type = #tpu.core_type<tc>, window_params = [{transform_indices = @transform_0, window_bounds = array<i64: 16, 128>}, {transform_indices = @transform_1, window_bounds = array<i64: 1, 128>}, {transform_indices = @transform_2, window_bounds = array<i64: 1, 128>}, {transform_indices = @transform_3, window_bounds = array<i64: 16, 128>}]} {
    %c0 = arith.constant 0 : index
    %c0_0 = arith.constant 0 : index
    %0 = vector.load %arg2[%c0, %c0_0] : memref<16x128xf32, #tpu.memory_space<vmem>>, vector<16x128xf32>
    %c0_1 = arith.constant 0 : index
    %c0_2 = arith.constant 0 : index
    %1 = vector.load %arg3[%c0_1, %c0_2] : memref<1x128xf32, #tpu.memory_space<vmem>>, vector<1x128xf32>
    %2 = vector.broadcast %1 : vector<1x128xf32> to vector<16x128xf32>
    %3 = arith.mulf %0, %2 : vector<16x128xf32>
    %c0_3 = arith.constant 0 : index
    %c0_4 = arith.constant 0 : index
    %4 = vector.load %arg4[%c0_3, %c0_4] : memref<1x128xf32, #tpu.memory_space<vmem>>, vector<1x128xf32>
    %5 = vector.broadcast %4 : vector<1x128xf32> to vector<16x128xf32>
    %6 = arith.addf %3, %5 : vector<16x128xf32>
    %c0_5 = arith.constant 0 : index
    %c0_6 = arith.constant 0 : index
    %7 = vector.load %arg5[%c0_5, %c0_6] : memref<16x128xf32, #tpu.memory_space<vmem>>, vector<16x128xf32>
    tpu.vector_store %arg5[%c0_5, %c0_6], %6 {strides = array<i32>} : memref<16x128xf32, #tpu.memory_space<vmem>>, vector<16x128xf32>,
    return
  }
  func.func @transform_0(%arg0: i32, %arg1: i32) -> (i32, i32) {
    %c0_i32 = arith.constant 0 : i32
    return %arg0, %arg1 : i32, i32
  }
  func.func @transform_1(%arg0: i32, %arg1: i32) -> (i32, i32) {
    %c0_i32 = arith.constant 0 : i32
    %c0_i32_0 = arith.constant 0 : i32
    return %c0_i32, %arg1 : i32, i32
  }
  func.func @transform_2(%arg0: i32, %arg1: i32) -> (i32, i32) {
    %c0_i32 = arith.constant 0 : i32
    %c0_i32_0 = arith.constant 0 : i32
    return %c0_i32, %arg1 : i32, i32
  }
  func.func @transform_3(%arg0: i32, %arg1: i32) -> (i32, i32) {
    %c0_i32 = arith.constant 0 : i32
    return %arg0, %arg1 : i32, i32
  }
}

</mosaic_0001>

<bundles_post_ra>
// kernel: tpu_custom_call.1
= control target key start
LH: loop header
LB: loop body
LE: loop exit
PB: predicated region body
PF: predicated region fallthrough
CT: control target
= control target key end

     0   :  { %8 = vsyncpa [#allocation3], 0  ;;  %s154_s0 = inlined_call_operand.hbm [shape: f32[16,128], index: 0, kind: input, shape index: {}]   ;;  %s155_s1 = inlined_call_operand.vmem [shape: f32[1,128], index: 1, kind: input, shape index: {}]   ;;  %s156_s2 = inlined_call_operand.vmem [shape: f32[1,128], index: 2, kind: input, shape index: {}]   ;;  %s157_s3 = inlined_call_operand.hbm [shape: f32[16,128], index: 3, kind: output, shape index: {}]  }
   0x1   :  { %9 = vsyncpa [#allocation4], 0  ;;  %s118_s12 = smov [#allocation2]  }
   0x2   :  { %s15_s13 = sshll.u32 %s118_s12, 4  ;;  %s16_s13 = int_to_ptr.vmem [resolvable:$true] %s15_s13 }
   0x3   :  { %s82_s14 = scalar_lea.vmem %s16_s13, 256  ;;  %p87_p1 = scmp.lt.s32.totalorder %s16_s13, %s16_s13 }
   0x4   :  { %p83_p0 = scmp.ne.s32.totalorder %s16_s13, %s82_s14  ;;  %p88_p2 = scmp.lt.s32.totalorder %s82_s14, %s82_s14 }
   0x6   :  { %p89_p3 = por %p88_p2, %p87_p1 }
   0x8   :  { %p90_p4 = pnand %p89_p3, %p83_p0 }
   0xa   :  { %93 = shalt.err (!%p90_p4)
}
   0xb   :  { %s119_s15 = smov 128   ;;  %s120_s16 = smov 8  }
   0xc   :  { %21 = dma.hbm_to_vmem [thread:$0]  %s154_s0, 256, %s16_s13, [#allocation3], %s119_s15, %s119_s15, %s120_s16  }
   0xd   :  { %114 = dma.done.wait [#allocation3], 256  }
   0xe   :  { %115 = vsyncadd [#allocation3], 4294967040  ;;  %v29_v0 = vld [vmem:[#allocation2] sm:$0xff]  ;;  %v30_v4 = vld [vmem:[#allocation2 + $0x8] sm:$0xff]  ;;  %s121_s23 = smov [#allocation5]  }
   0xf   :  { %v68_v1 = vld [vmem:[%s155_s1] ss:$0 sm:$0xff]  ;;  %s56_s24 = sshll.u32 %s121_s23, 4  ;;  %s57_s24 = int_to_ptr.vmem [resolvable:$true] %s56_s24 }
  0x10   :  { %v69_v2 = vld [vmem:[%s156_s2] ss:$0 sm:$0xff]  ;;  %v38_v3 = vmul.f32 %v68_v1, %v29_v0  ;;  %v39_v5 = vmul.f32 %v68_v1, %v30_v4  ;;  %s94_s0 = scalar_lea.vmem %s57_s24, 256  ;;  %p99_p6 = scmp.lt.s32.totalorder %s57_s24, %s57_s24 }
  0x11   :  { %p95_p5 = scmp.ne.s32.totalorder %s57_s24, %s94_s0  ;;  %p100_p7 = scmp.lt.s32.totalorder %s94_s0, %s94_s0 }
  0x12   :  { %v47_v6 = vadd.f32 %v69_v2, %v38_v3  ;;  %v48_v7 = vadd.f32 %v69_v2, %v39_v5 }
  0x13   :  { %p101_p8 = por %p100_p7, %p99_p6 }
  0x14   :  { %49 = vst [vmem:[#allocation5] sm:$0xff] %v47_v6  ;;  %50 = vst [vmem:[#allocation5 + $0x8] sm:$0xff] %v48_v7 }
  0x15   :  { %p102_p9 = pnand %p101_p8, %p95_p5 }
  0x17   :  { %105 = shalt.err (!%p102_p9)
}
  0x18   :  { %62 = dma.vmem_to_hbm [thread:$0]  %s57_s24, 256, %s157_s3, [#allocation4], %s119_s15, %s119_s15, %s120_s16  }
  0x19   :  { %116 = dma.done.wait [#allocation4], 256  }
  0x1a   :  { %117 = vsyncadd [#allocation4], 4294967040 }
  0x1b   :  { %66 = vsyncpa [#allocation3], 1 }
  0x1c   :  { %67 = vsyncpa [#allocation4], 1 }

</bundles_post_ra>
